<compile_context>
chip_gen: v7x
topology: tpu7x:2x2x1
jax: 0.10.0
libtpu: 0.0.40
codegen_flags: <defaults>
</compile_context>

<pallas_src>
import functools

import jax
import jax.numpy as jnp
from jax.experimental import pallas as pl
from jax.experimental.pallas import tpu as pltpu


def _quantile_loss_kernel(preds_ref, tgt_ref, out_ref, acc_ref, *,
                          quantiles, n_valid, tn, blocks_per_core, inv_total):
    c = pl.program_id(0)          # partial-sum / core index ("parallel")
    i = pl.program_id(1)          # block index within this core ("arbitrary")

    @pl.when(i == 0)
    def _():
        acc_ref[...] = jnp.zeros_like(acc_ref)

    preds = preds_ref[...].astype(jnp.float32)      # (Q, tn)
    tgt = tgt_ref[...].astype(jnp.float32)          # (1, tn)
    q_count = preds.shape[0]

    # Quantiles as compile-time constants laid out along sublanes: (Q, 1).
    sub = jax.lax.broadcasted_iota(jnp.int32, (q_count, 1), 0)
    q_col = jnp.zeros((q_count, 1), jnp.float32)
    for idx, qv in enumerate(quantiles):
        q_col = jnp.where(sub == idx, jnp.float32(qv), q_col)
    qm1_col = q_col - 1.0

    err = tgt - preds                                # broadcast -> (Q, tn)
    loss = jnp.maximum(q_col * err, qm1_col * err)   # pinball loss

    # Mask lanes past the true sample count (partial last block, and the
    # clamped overflow blocks of the tail core).
    block_id = c * blocks_per_core + i
    lane = jax.lax.broadcasted_iota(jnp.int32, (1, tn), 1)
    valid = (block_id * tn + lane) < n_valid
    loss = jnp.where(valid, loss, 0.0)

    acc_ref[...] += loss                             # elementwise, VPU only

    @pl.when(i == blocks_per_core - 1)
    def _():
        # One cross-lane reduce per core, then the pre-computed 1/(N*Q) scale.
        out_ref[0, 0] = jnp.sum(acc_ref[...]) * jnp.float32(inv_total)


def quantile_loss(preds, target, quantiles, *, tn=65536, num_cores=2,
                  buffers=None):
    """Pallas equivalent of QuantileLoss(quantiles)(preds, target).

    preds:  (B, T, Q)    f32 or bf16
    target: (B, T) or (B, T, 1)
    quantiles: python list/tuple of floats, length Q
    tn:      lane-tile size (samples per grid step); multiple of 128
    returns: scalar float32 mean pinball loss
    """
    if target.ndim == 2:
        target = target[..., None]

    B, T, Q = preds.shape
    assert len(quantiles) == Q, "quantiles length must match preds last dim"
    N = B * T
    total = N * Q
    inv_total = 1.0 / float(total)          # exact in Python float64

    # Lane-dense layout: samples on the 128-lane axis, quantiles on sublanes.
    preds_t = preds.reshape(N, Q).T          # (Q, N)
    tgt_row = target.reshape(1, N)           # (1, N)

    # Lane tile: a large multiple of 128, or the full axis when it is small.
    tn = max(128, (int(tn) // 128) * 128)
    tn_eff = N if N <= tn else tn
    blocks = pl.cdiv(N, tn_eff)
    n_cores = min(int(num_cores), blocks) if blocks >= 1 else 1
    n_cores = max(n_cores, 1)
    bpc = pl.cdiv(blocks, n_cores)

    def lane_map(c, i):
        # Clamp overflow steps of the tail core to the last valid block; their
        # contribution is zeroed by the in-kernel mask.
        return (0, jnp.minimum(c * bpc + i, blocks - 1))

    if buffers is None:
        preds_spec = pl.BlockSpec((Q, tn_eff), lane_map)
    else:
        # Optional pipeline-depth sweep (e.g. 3 on v6e once tiles are large).
        preds_spec = pl.BlockSpec((Q, tn_eff), lane_map,
                                  pipeline_mode=pl.Buffered(buffers))

    kernel = functools.partial(
        _quantile_loss_kernel,
        quantiles=tuple(float(q) for q in quantiles),
        n_valid=N,
        tn=tn_eff,
        blocks_per_core=bpc,
        inv_total=inv_total,
    )

    partials = pl.pallas_call(
        kernel,
        out_shape=jax.ShapeDtypeStruct((n_cores, 1), jnp.float32),
        grid_spec=pltpu.PrefetchScalarGridSpec(
            num_scalar_prefetch=0,
            grid=(n_cores, bpc),
            in_specs=[
                preds_spec,                                  # (Q, tn) preds
                pl.BlockSpec((1, tn_eff), lane_map),         # (1, tn) target
            ],
            out_specs=pl.BlockSpec((1, 1), lambda c, i: (c, 0),
                                   memory_space=pltpu.SMEM),
            scratch_shapes=[pltpu.VMEM((Q, tn_eff), jnp.float32)],
        ),
        compiler_params=pltpu.CompilerParams(
            dimension_semantics=("parallel", "arbitrary")),
    )(preds_t, tgt_row)

    return jnp.sum(partials)


def _reference(preds, target, quantiles):
    # Pure-JAX reference mirroring the PyTorch forward exactly (in f32).
    preds = preds.astype(jnp.float32)
    target = target.astype(jnp.float32)
    if target.ndim == 2:
        target = target[..., None]
    target_expanded = jnp.broadcast_to(target, preds.shape)
    errors = target_expanded - preds
    q = jnp.asarray(quantiles, dtype=jnp.float32)
    losses = jnp.maximum(q * errors, (q - 1.0) * errors)
    return jnp.mean(losses)


if __name__ == "__main__":
    key = jax.random.PRNGKey(0)

    # Case 1: small, single block (matches the module's typical usage shape).
    k1, k2, k3, k4 = jax.random.split(key, 4)
    quantiles = [0.1, 0.5, 0.9]
    B, T, Q = 4, 16, len(quantiles)
    preds = jax.random.normal(k1, (B, T, Q), dtype=jnp.float32)
    target = jax.random.normal(k2, (B, T), dtype=jnp.float32)

    loss = jax.block_until_ready(quantile_loss(preds, target, quantiles))
    ref = jax.block_until_ready(_reference(preds, target, quantiles))
    assert jnp.allclose(loss, ref, rtol=1e-5, atol=1e-6), (loss, ref)

    # Case 2: exercises multi-block grid, per-core partial sums, partial-block
    # masking, and the clamped overflow step of the tail core.
    quantiles2 = [0.05, 0.25, 0.5, 0.75, 0.95]
    B2, T2, Q2 = 8, 300, len(quantiles2)
    preds2 = jax.random.normal(k3, (B2, T2, Q2), dtype=jnp.float32)
    target2 = jax.random.normal(k4, (B2, T2), dtype=jnp.float32)

    loss2 = jax.block_until_ready(
        quantile_loss(preds2, target2, quantiles2, tn=512, num_cores=2))
    ref2 = jax.block_until_ready(_reference(preds2, target2, quantiles2))
    assert jnp.allclose(loss2, ref2, rtol=1e-4, atol=1e-6), (loss2, ref2)

    print("KERNEL_OK")
</pallas_src>

<mosaic_0001>
module attributes {stable_mosaic.version = 11 : i64} {
  func.func @_quantile_loss_kernel(%arg0: i32, %arg1: i32, %arg2: memref<3x64xf32, #tpu.memory_space<vmem>>, %arg3: memref<1x64xf32, #tpu.memory_space<vmem>>, %arg4: memref<1x1xf32, #tpu.memory_space<smem>>, %arg5: memref<3x64xf32, #tpu.memory_space<vmem>>) attributes {dimension_semantics = [#tpu.dimension_semantics<parallel>, #tpu.dimension_semantics<arbitrary>], iteration_bounds = array<i64: 1, 1>, scalar_prefetch = 0 : i64, scratch_operands = 1 : i64, tpu.core_type = #tpu.core_type<tc>, window_params = [{transform_indices = @transform_0, window_bounds = array<i64: 3, 64>}, {transform_indices = @transform_1, window_bounds = array<i64: 1, 64>}, {transform_indices = @transform_2, window_bounds = array<i64: 1, 1>}]} {
    %c0_i32 = arith.constant 0 : i32
    %0 = arith.cmpi eq, %arg1, %c0_i32 : i32
    %1 = arith.extui %0 : i1 to i32
    %c0_i32_0 = arith.constant 0 : i32
    %2 = arith.cmpi ne, %1, %c0_i32_0 : i32
    scf.if %2 {
      %cst_18 = arith.constant 0.000000e+00 : f32
      %46 = vector.broadcast %cst_18 : f32 to vector<3x64xf32>
      %c0_19 = arith.constant 0 : index
      %c0_20 = arith.constant 0 : index
      %47 = vector.load %arg5[%c0_19, %c0_20] : memref<3x64xf32, #tpu.memory_space<vmem>>, vector<3x64xf32>
      tpu.vector_store %arg5[%c0_19, %c0_20], %46 {strides = array<i32>} : memref<3x64xf32, #tpu.memory_space<vmem>>, vector<3x64xf32>,
    } else {
    }
    %c0 = arith.constant 0 : index
    %c0_1 = arith.constant 0 : index
    %3 = vector.load %arg2[%c0, %c0_1] : memref<3x64xf32, #tpu.memory_space<vmem>>, vector<3x64xf32>
    %c0_2 = arith.constant 0 : index
    %c0_3 = arith.constant 0 : index
    %4 = vector.load %arg3[%c0_2, %c0_3] : memref<1x64xf32, #tpu.memory_space<vmem>>, vector<1x64xf32>
    %5 = tpu.iota {dimensions = array<i32: 0>} : vector<3x1xi32>
    %cst = arith.constant 0.000000e+00 : f32
    %6 = vector.broadcast %cst : f32 to vector<3x1xf32>
    %c0_i32_4 = arith.constant 0 : i32
    %7 = vector.broadcast %c0_i32_4 : i32 to vector<3x1xi32>
    %8 = arith.cmpi eq, %5, %7 : vector<3x1xi32>
    %cst_5 = arith.constant 1.000000e-01 : f32
    %9 = vector.broadcast %cst_5 : f32 to vector<3x1xf32>
    %10 = arith.select %8, %9, %6 : vector<3x1xi1>, vector<3x1xf32>
    %c1_i32 = arith.constant 1 : i32
    %11 = vector.broadcast %c1_i32 : i32 to vector<3x1xi32>
    %12 = arith.cmpi eq, %5, %11 : vector<3x1xi32>
    %cst_6 = arith.constant 5.000000e-01 : f32
    %13 = vector.broadcast %cst_6 : f32 to vector<3x1xf32>
    %14 = arith.select %12, %13, %10 : vector<3x1xi1>, vector<3x1xf32>
    %c2_i32 = arith.constant 2 : i32
    %15 = vector.broadcast %c2_i32 : i32 to vector<3x1xi32>
    %16 = arith.cmpi eq, %5, %15 : vector<3x1xi32>
    %cst_7 = arith.constant 0.899999976 : f32
    %17 = vector.broadcast %cst_7 : f32 to vector<3x1xf32>
    %18 = arith.select %16, %17, %14 : vector<3x1xi1>, vector<3x1xf32>
    %cst_8 = arith.constant 1.000000e+00 : f32
    %19 = vector.broadcast %cst_8 : f32 to vector<3x1xf32>
    %20 = arith.subf %18, %19 : vector<3x1xf32>
    %21 = vector.broadcast %4 : vector<1x64xf32> to vector<3x64xf32>
    %22 = arith.subf %21, %3 : vector<3x64xf32>
    %23 = vector.broadcast %18 : vector<3x1xf32> to vector<3x64xf32>
    %24 = arith.mulf %23, %22 : vector<3x64xf32>
    %25 = vector.broadcast %20 : vector<3x1xf32> to vector<3x64xf32>
    %26 = arith.mulf %25, %22 : vector<3x64xf32>
    %27 = arith.maximumf %24, %26 : vector<3x64xf32>
    %c1_i32_9 = arith.constant 1 : i32
    %28 = arith.muli %arg0, %c1_i32_9 : i32
    %29 = arith.addi %28, %arg1 : i32
    %30 = tpu.iota {dimensions = array<i32: 1>} : vector<1x64xi32>
    %c64_i32 = arith.constant 64 : i32
    %31 = arith.muli %29, %c64_i32 : i32
    %32 = vector.broadcast %31 : i32 to vector<1x64xi32>
    %33 = arith.addi %32, %30 : vector<1x64xi32>
    %c64_i32_10 = arith.constant 64 : i32
    %34 = vector.broadcast %c64_i32_10 : i32 to vector<1x64xi32>
    %35 = arith.cmpi slt, %33, %34 : vector<1x64xi32>
    %cst_11 = arith.constant 0.000000e+00 : f32
    %36 = vector.shape_cast %35 : vector<1x64xi1> to vector<1x64xi1>
    %37 = vector.broadcast %36 : vector<1x64xi1> to vector<3x64xi1>
    %38 = vector.broadcast %cst_11 : f32 to vector<3x64xf32>
    %39 = arith.select %37, %27, %38 : vector<3x64xi1>, vector<3x64xf32>
    %c0_12 = arith.constant 0 : index
    %c0_13 = arith.constant 0 : index
    %40 = vector.load %arg5[%c0_12, %c0_13] : memref<3x64xf32, #tpu.memory_space<vmem>>, vector<3x64xf32>
    %41 = arith.addf %40, %39 : vector<3x64xf32>
    %c0_14 = arith.constant 0 : index
    %c0_15 = arith.constant 0 : index
    %42 = vector.load %arg5[%c0_14, %c0_15] : memref<3x64xf32, #tpu.memory_space<vmem>>, vector<3x64xf32>
    tpu.vector_store %arg5[%c0_14, %c0_15], %41 {strides = array<i32>} : memref<3x64xf32, #tpu.memory_space<vmem>>, vector<3x64xf32>,
    %c0_i32_16 = arith.constant 0 : i32
    %43 = arith.cmpi eq, %arg1, %c0_i32_16 : i32
    %44 = arith.extui %43 : i1 to i32
    %c0_i32_17 = arith.constant 0 : i32
    %45 = arith.cmpi ne, %44, %c0_i32_17 : i32
    scf.if %45 {
      %c0_18 = arith.constant 0 : index
      %c0_19 = arith.constant 0 : index
      %46 = vector.load %arg5[%c0_18, %c0_19] : memref<3x64xf32, #tpu.memory_space<vmem>>, vector<3x64xf32>
      %47 = vector.shape_cast %46 : vector<3x64xf32> to vector<1x3x64xf32>
      %cst_20 = arith.constant dense<0.000000e+00> : vector<1xf32>
      %48 = vector.multi_reduction <add>, %47, %cst_20 [1, 2] : vector<1x3x64xf32> to vector<1xf32>
      %49 = vector.shape_cast %48 : vector<1xf32> to vector<1x1x1xf32>
      %50 = vector.extract %49[0, 0, 0] : f32 from vector<1x1x1xf32>
      %cst_21 = arith.constant 0.00520833349 : f32
      %51 = arith.mulf %50, %cst_21 : f32
      %c0_22 = arith.constant 0 : index
      %c0_23 = arith.constant 0 : index
      %52 = memref.load %arg4[%c0_22, %c0_23] : memref<1x1xf32, #tpu.memory_space<smem>>
      memref.store %51, %arg4[%c0_22, %c0_23] : memref<1x1xf32, #tpu.memory_space<smem>>
    } else {
    }
    return
  }
  func.func @transform_0(%arg0: i32, %arg1: i32) -> (i32, i32) {
    %c1_i32 = arith.constant 1 : i32
    %0 = arith.muli %arg0, %c1_i32 : i32
    %1 = arith.addi %0, %arg1 : i32
    %c0_i32 = arith.constant 0 : i32
    %2 = arith.minsi %1, %c0_i32 : i32
    %c0_i32_0 = arith.constant 0 : i32
    %c0_i32_1 = arith.constant 0 : i32
    return %c0_i32_0, %2 : i32, i32
  }
  func.func @transform_1(%arg0: i32, %arg1: i32) -> (i32, i32) {
    %c1_i32 = arith.constant 1 : i32
    %0 = arith.muli %arg0, %c1_i32 : i32
    %1 = arith.addi %0, %arg1 : i32
    %c0_i32 = arith.constant 0 : i32
    %2 = arith.minsi %1, %c0_i32 : i32
    %c0_i32_0 = arith.constant 0 : i32
    %c0_i32_1 = arith.constant 0 : i32
    return %c0_i32_0, %2 : i32, i32
  }
  func.func @transform_2(%arg0: i32, %arg1: i32) -> (i32, i32) {
    %c0_i32 = arith.constant 0 : i32
    %c0_i32_0 = arith.constant 0 : i32
    return %arg0, %c0_i32 : i32, i32
  }
}

</mosaic_0001>

<bundles_post_ra>
// kernel: tpu_custom_call.1
= control target key start
LH: loop header
LB: loop body
LE: loop exit
PB: predicated region body
PF: predicated region fallthrough
CT: control target
= control target key end

     0   :  { %7 = vsyncpa [#allocation4], 0  ;;  %s224_s0 = inlined_call_operand.hbm [shape: f32[3,64], index: 0, kind: input, shape index: {}]   ;;  %s225_s1 = inlined_call_operand.vmem [shape: f32[1,64], index: 1, kind: input, shape index: {}]   ;;  %s226_s2 = inlined_call_operand.hbm [shape: f32[1,1], index: 2, kind: output, shape index: {}]  }
   0x1   :  { %8 = vsyncpa [#allocation5], 0  ;;  %s176_s9 = smov [#allocation3]   ;;  %s140_s13 = scalar_lea.hbm %s224_s0, 64 }
   0x2   :  { %s20_s10 = sshll.u32 %s176_s9, 4  ;;  %p141_p0 = scmp.ne.s32.totalorder %s224_s0, %s140_s13  ;;  %s21_s10 = int_to_ptr.vmem [resolvable:$true] %s20_s10 }
   0x3   :  { %p144_p1 = scmp.lt.u32.totalorder %s140_s13, %s224_s0 }
   0x5   :  { %p146_p2 = pnand %p144_p1, %p141_p0 }
   0x7   :  { %149 = shalt.err (!%p146_p2)
}
   0x8   :  { %s150_s18 = scalar_lea.vmem %s21_s10, 64  ;;  %p155_p4 = scmp.lt.s32.totalorder %s21_s10, %s21_s10 }
   0x9   :  { %p151_p3 = scmp.ne.s32.totalorder %s21_s10, %s150_s18  ;;  %p156_p5 = scmp.lt.s32.totalorder %s150_s18, %s150_s18 }
   0xb   :  { %p157_p6 = por %p156_p5, %p155_p4 }
   0xd   :  { %p158_p7 = pnand %p157_p6, %p151_p3 }
   0xf   :  { %161 = shalt.err (!%p158_p7)
}
  0x10   :  { %23 = dma.hbm_to_vmem [thread:$0]  %s224_s0, 64, %s21_s10, [#allocation4]  }
  0x11   :  { %172 = dma.done.wait [#allocation4], 64  }
  0x12   :  { %173 = vsyncadd [#allocation4], 4294967232  ;;  %vm60_vm0 = vcmask 518144   ;;  %v64_v0 = vlaneseq  ;;  %v177_v1 = vmov 0.0   ;;  %v62_v6 = vld [vmem:[#allocation3] sm:$0x7] }
  0x13   :  { %61 = vst.msk [vmem:[#allocation2] sm:$0x7] %vm60_vm0, %v177_v1  ;;  %v134_v7 = vld [vmem:[%s225_s1] ss:$0 sm:$0xff]  ;;  %s162_s25 = scalar_lea.hbm %s226_s2, 16 }
  0x14   :  { %v65_v2 = vshrl.u32 %v64_v0, 7  ;;  %v85_v5 = vand.u32 127, %v64_v0  ;;  %v79_v10 = vsub.f32 %v134_v7, %v62_v6  ;;  %p163_p8 = scmp.ne.s32.totalorder %s226_s2, %s162_s25  ;;  %p166_p9 = scmp.lt.u32.totalorder %s162_s25, %s226_s2 }
  0x16   :  { %vm66_vm1 = vcmp.eq.s32.totalorder %v65_v2, 0  ;;  %vm68_vm2 = vcmp.eq.s32.totalorder %v65_v2, 1  ;;  %vm70_vm3 = vcmp.eq.s32.totalorder %v65_v2, 2  ;;  %vm89_vm4 = vcmp.lt.s32.totalorder %v85_v5, 64  ;;  %p168_p10 = pnand %p166_p9, %p163_p8 }
  0x17   :  { %v67_v3 = vsel %vm66_vm1, 0.1, %v177_v1 }
  0x18   :  { %v69_v4 = vsel %vm68_vm2, 0.5, %v67_v3 }
  0x19   :  { %v71_v8 = vsel %vm70_vm3, 0.9, %v69_v4 }
  0x1a   :  { %v133_v9 = vadd.f32 -1.0, %v71_v8  ;;  %v80_v11 = vmul.f32 %v79_v10, %v71_v8  ;;  %v93_v14 = vld [vmem:[#allocation2] sm:$0x7] }
  0x1c   :  { %v81_v12 = vmul.f32 %v133_v9, %v79_v10 }
  0x1e   :  { %v82_v13 = vmax.f32 %v80_v11, %v81_v12 }
  0x20   :  { %v92_v15 = vsel %vm89_vm4, %v82_v13, 0.0 }
  0x21   :  { %v94_v16 = vadd.f32 %v93_v14, %v92_v15 }
  0x23   :  { %96 = vst.msk [vmem:[#allocation2] sm:$0x7] %vm60_vm0, %v94_v16 }
  0x2a   :  { %v100_v17 = vld [vmem:[#allocation2] sm:$0x7] }
  0x2b   :  { %v101_v18 = vsel %vm60_vm0, %v100_v17, 0.0 }
  0x2c   :  { %102 = vadd.xlane.f32.xlu0 %v101_v18 }
  0xb9   :  { %v103_v19 = vpop.xlane.xlu0 %102 }
  0xba   :  { %v104_v20 = vrot.slane %v103_v19, 4 }
  0xbc   :  { %v105_v21 = vadd.f32 %v104_v20, %v103_v19 }
  0xbe   :  { %v106_v22 = vrot.slane %v105_v21, 2 }
  0xc0   :  { %v107_v23 = vadd.f32 %v106_v22, %v105_v21 }
  0xc2   :  { %v108_v24 = vrot.slane %v107_v23, 1 }
  0xc4   :  { %v109_v25 = vadd.f32 %v108_v24, %v107_v23 }
  0xc6   :  { %135 = vpush %v109_v25 }
  0xf7   :  { %s136_s0 = spop %135 }
  0xf8   :  { %s111_s1 = smul.f32 0.0052083335, %s136_s0 }
  0xfa   :  { %113 = sst [smem:[#allocation6]] %s111_s1 }
  0xfb   :  { %171 = shalt.err (!%p168_p10)
}
  0xfc   :  { %s178_s30 = smov [#allocation6]  }
  0xfd   :  { %121 = dma.smem_to_hbm %s178_s30, 16, %s226_s2, [#allocation5]  }
  0xfe   :  { %174 = dma.done.wait [#allocation5], 16  }
  0xff   :  { %175 = vsyncadd [#allocation5], 4294967280 }
 0x100   :  { %125 = sfence }
 0x101   :  { %126 = vsyncpa [#allocation4], 1 }
 0x102   :  { %127 = vsyncpa [#allocation5], 1 }

</bundles_post_ra>
